<compile_context>
chip_gen: v7x
topology: tpu7x:2x2x1
jax: 0.10.0
libtpu: 0.0.40
codegen_flags: <defaults>
</compile_context>

<pallas_src>
import math

import jax
import jax.numpy as jnp
from jax.experimental import pallas as pl
from jax.experimental.pallas import tpu as pltpu

_LN2 = 0.6931471805599453
_LANE = 128
_MAX_TILE_BYTES = 8 * 1024 * 1024       # per streamed input, per buffer


def _sublane_multiple(*dtypes):
    """Native sublane packing multiple: 8 for 4-byte, 16 for 2-byte, 32 for 1-byte."""
    m = 8
    for dt in dtypes:
        isz = jnp.dtype(dt).itemsize
        m = max(m, 32 // max(1, min(4, isz)))
    return m


def _vmem_limit_bytes():
    """Generation-aware scoped-VMEM limit (~48 MiB on v7x, up to 96 MiB on v5e/v6e)."""
    cap = 64 * 1024 * 1024
    try:
        info = pltpu.get_tpu_info()
        cap = int(getattr(info, "vmem_capacity_bytes", cap)) or cap
    except Exception:
        pass
    return max(32 * 1024 * 1024, min((cap * 3) // 4, 96 * 1024 * 1024))


def _choose_tiles(rows, cols, stream_bytes_per_elem, sublane, vmem_limit):
    """Pick (row_tile, col_tile).  col_tile always divides cols (or equals it);
    both are sized so double-buffered streamed tiles stay well under the limit."""
    budget = int(vmem_limit * 0.55)
    max_elems = budget // (2 * max(1, stream_bytes_per_elem))
    max_elems = max(sublane * _LANE, min(max_elems, _MAX_TILE_BYTES // 4))

    # Column tile: full width whenever it comfortably fits; otherwise the
    # largest lane-dense (multiple-of-128) divisor of cols that fits the budget.
    if cols <= max(4096, max_elems // (2 * sublane)):
        col_tile = cols
    else:
        limit = max(_LANE, min(max_elems // sublane, 32768))
        col_tile = None
        c = (limit // _LANE) * _LANE
        while c >= _LANE:
            if cols % c == 0:
                col_tile = c
                break
            c -= _LANE
        if col_tile is None:
            # No lane-dense divisor (cols not a multiple of 128): block last dim
            # must be a multiple of 128 or the full extent, so fall back to the
            # full width with the minimum row tile.
            col_tile = cols

    # Row tile (multiple of the native sublane count, or full extent if tiny).
    if rows < sublane:
        row_tile = rows
    else:
        rt = (max_elems // max(1, col_tile)) // sublane * sublane
        row_tile = max(sublane, min(rt, (rows // sublane) * sublane))
    return row_tile, col_tile


def _make_kernel(n_rows, row_tile, steps, col_blocks, weighted):
    """Kernel body. Ref order: ([w,] x, t, out, acc)."""

    def kernel(*refs):
        if weighted:
            w_ref, x_ref, t_ref, o_ref, acc_ref = refs
        else:
            x_ref, t_ref, o_ref, acc_ref = refs

        c = pl.program_id(0)
        i = pl.program_id(1)
        j = pl.program_id(2)

        @pl.when((i == 0) & (j == 0))
        def _init():
            acc_ref[...] = jnp.zeros_like(acc_ref)

        # In-kernel upcast; numerically stable log-cosh:
        #   log(cosh(d)) = |d| + log1p(exp(-2|d|)) - log(2)
        d = x_ref[...].astype(jnp.float32) - t_ref[...].astype(jnp.float32)
        a = jnp.abs(d)
        loss = a + jnp.log1p(jnp.exp(-2.0 * a)) - jnp.float32(_LN2)
        if weighted:
            loss = w_ref[...].astype(jnp.float32) * loss

        # NOTE: the ragged-row mask must use the *logical* row-block id
        # (c * steps + i), NOT the clamped block index returned by the
        # index_map; clamped duplicate tail blocks are zeroed instead of being
        # counted twice.  Do not "simplify" this to the clamped id.
        # Interior (full) blocks skip the mask entirely (pl.when gate).
        blk = c * steps + i
        is_full = (blk + 1) * row_tile <= n_rows

        @pl.when(is_full)
        def _interior():
            acc_ref[...] += jnp.sum(loss, axis=0, keepdims=True)

        @pl.when(jnp.logical_not(is_full))
        def _ragged_tail():
            row_ids = blk * row_tile + jax.lax.broadcasted_iota(
                jnp.int32, (row_tile, 1), 0)
            masked = jnp.where(row_ids < n_rows, loss, 0.0)
            acc_ref[...] += jnp.sum(masked, axis=0, keepdims=True)

        @pl.when((i == steps - 1) & (j == col_blocks - 1))
        def _finalize():
            o_ref[0, 0] = jnp.sum(acc_ref[...])

    return kernel


def _classify_weights(w, shape, n_tail, rows, cols):
    """Return (mode, 2-D weight array) for non-scalar weights broadcastable to shape."""
    nd = len(shape)
    if w.ndim > nd:
        # TODO(synk): weights with more dims than the input (result-enlarging
        # broadcast) are not supported by this kernel.
        raise ValueError("weights with more dims than the input are not supported")
    ws = (1,) * (nd - w.ndim) + tuple(w.shape)
    for a, b in zip(ws, shape):
        if a != 1 and a != b:
            raise ValueError(f"weights shape {w.shape} not broadcastable to {shape}")
    lead, tail = ws[: nd - n_tail], ws[nd - n_tail:]
    wb = w.reshape(ws)
    if all(s == 1 for s in tail):
        # Per-row (e.g. per-channel / per-sample): stream only a (rows, 1) vector.
        wr = jnp.broadcast_to(wb, shape[: nd - n_tail] + (1,) * n_tail)
        return "row", wr.reshape(rows, 1)
    if all(s == 1 for s in lead):
        # Per-column (e.g. spatial): stream only a (1, cols) vector.
        wc = jnp.broadcast_to(wb, (1,) * (nd - n_tail) + shape[nd - n_tail:])
        return "col", wc.reshape(1, cols)
    # Weights vary over both leading and trailing dims: stream the full broadcast.
    return "full", jnp.broadcast_to(wb, shape).reshape(rows, cols)


def weighted_log_cosh_loss(inp, target, weights=None):
    """Pallas implementation of WeightedLogCoshLoss.forward (returns a scalar)."""
    assert inp.shape == target.shape, "input/target shapes must match"
    shape = tuple(inp.shape)
    nd = len(shape)
    n_total = int(math.prod(shape)) if nd else 1

    out_dt = jnp.result_type(inp.dtype, target.dtype)
    w = None
    if weights is not None:
        w = jnp.asarray(weights)
        out_dt = jnp.result_type(out_dt, w.dtype)
    if not jnp.issubdtype(out_dt, jnp.floating):
        out_dt = jnp.float32

    if n_total == 0:
        return jnp.zeros((), out_dt)

    # Scalar weights are folded into the final sum (cheapest path, no w stream).
    w_scalar = None
    if w is not None and w.size == 1:
        w_scalar = w.reshape(()).astype(jnp.float32)
        w = None

    # ---- choose the 2-D (rows, cols) view ----------------------------------
    n_tail = min(2, nd)
    rows_t = max(1, math.prod(shape[: nd - n_tail]))
    cols_t = max(1, math.prod(shape[nd - n_tail:]))

    if w is None:
        # Unweighted / scalar-weighted: free 1-D flatten into a lane-dense
        # (rows, C) view with C a multiple of 128 whenever one divides N.
        cols = None
        for cand in range(4096, _LANE - 1, -_LANE):
            if n_total % cand == 0:
                cols = cand
                break
        if cols is None:
            rows, cols = rows_t, cols_t
        else:
            rows = n_total // cols
        mode, w2 = "none", None
        x2 = inp.reshape(rows, cols)
        t2 = target.reshape(rows, cols)
    else:
        rows, cols = rows_t, cols_t
        x2 = inp.reshape(rows, cols)
        t2 = target.reshape(rows, cols)
        mode, w2 = _classify_weights(w, shape, n_tail, rows, cols)

    # ---- tiling --------------------------------------------------------------
    sub_dtypes = [inp.dtype, target.dtype]
    if mode in ("row", "full"):
        sub_dtypes.append(w2.dtype)
    sublane = _sublane_multiple(*sub_dtypes)

    stream_bpe = jnp.dtype(inp.dtype).itemsize + jnp.dtype(target.dtype).itemsize
    if mode == "full":
        stream_bpe += jnp.dtype(w2.dtype).itemsize

    vmem_limit = _vmem_limit_bytes()
    row_tile, col_tile = _choose_tiles(rows, cols, stream_bpe, sublane, vmem_limit)

    nblocks = -(-rows // row_tile)                  # ceil div
    n_cores = 2 if nblocks >= 2 else 1              # v7x megacore split; harmless elsewhere
    steps = -(-nblocks // n_cores)
    col_blocks = cols // col_tile                   # col_tile divides cols by construction
    grid = (n_cores, steps, col_blocks)

    def data_map(c, i, j):
        # Clamp so tail steps never index a fully out-of-range row block; the
        # in-kernel mask (on the *logical* block id) zeroes duplicated rows.
        return (jnp.minimum(c * steps + i, nblocks - 1), j)

    def row_w_map(c, i, j):
        return (jnp.minimum(c * steps + i, nblocks - 1), 0)

    def col_w_map(c, i, j):
        return (0, j)

    tile_spec = pl.BlockSpec((row_tile, col_tile), data_map)
    if mode == "none":
        in_specs = [tile_spec, tile_spec]
        args = (x2, t2)
    elif mode == "row":
        in_specs = [pl.BlockSpec((row_tile, 1), row_w_map), tile_spec, tile_spec]
        args = (w2, x2, t2)
    elif mode == "col":
        in_specs = [pl.BlockSpec((1, col_tile), col_w_map), tile_spec, tile_spec]
        args = (w2, x2, t2)
    else:  # "full"
        in_specs = [tile_spec, tile_spec, tile_spec]
        args = (w2, x2, t2)

    kernel = _make_kernel(rows, row_tile, steps, col_blocks,
                          weighted=(mode != "none"))

    partials = pl.pallas_call(
        kernel,
        grid=grid,
        in_specs=in_specs,
        out_specs=pl.BlockSpec((1, 1), lambda c, i, j: (c, 0),
                               memory_space=pltpu.SMEM),
        out_shape=jax.ShapeDtypeStruct((n_cores, 1), jnp.float32),
        scratch_shapes=[pltpu.VMEM((1, col_tile), jnp.float32)],
        compiler_params=pltpu.CompilerParams(
            dimension_semantics=("parallel", "arbitrary", "arbitrary"),
            vmem_limit_bytes=vmem_limit,
        ),
    )(*args)

    total = jnp.sum(partials)
    if w_scalar is not None:
        total = total * w_scalar
    return total.astype(out_dt)


if __name__ == "__main__":
    key = jax.random.PRNGKey(0)
    k1, k2, k3, k4, k5 = jax.random.split(key, 5)

    # Small NCHW inputs.
    x = jax.random.normal(k1, (2, 4, 16, 16), dtype=jnp.float32)
    t = jax.random.normal(k2, (2, 4, 16, 16), dtype=jnp.float32)
    w_chan = jax.random.uniform(k3, (1, 4, 1, 1), dtype=jnp.float32)
    w_spat = jax.random.uniform(k4, (1, 1, 16, 16), dtype=jnp.float32)
    w_full = jax.random.uniform(k5, (2, 4, 16, 16), dtype=jnp.float32)

    def ref_loss(xx, tt, ww=None):
        l = jnp.log(jnp.cosh(xx.astype(jnp.float32) - tt.astype(jnp.float32)))
        if ww is not None:
            l = ww.astype(jnp.float32) * l
        return jnp.sum(l)

    checks = [
        ("unweighted", None),
        ("per-channel", w_chan),
        ("spatial", w_spat),
        ("full", w_full),
        ("scalar", jnp.float32(0.37)),
    ]
    for name, wt in checks:
        got = jax.block_until_ready(weighted_log_cosh_loss(x, t, wt))
        want = ref_loss(x, t, None if wt is None else jnp.asarray(wt))
        assert jnp.allclose(got, want, rtol=1e-4, atol=1e-4), (name, got, want)

    # bf16 inputs exercise the in-kernel upcast path.
    xb = x.astype(jnp.bfloat16)
    tb = t.astype(jnp.bfloat16)
    got_b = jax.block_until_ready(weighted_log_cosh_loss(xb, tb, None))
    want_b = ref_loss(xb, tb)
    assert jnp.allclose(jnp.asarray(got_b, jnp.float32), want_b,
                        rtol=2e-2, atol=1e-1), (got_b, want_b)

    print("KERNEL_OK")
</pallas_src>

<mosaic_0001>
module attributes {stable_mosaic.version = 11 : i64} {
  func.func @kernel(%arg0: i32, %arg1: i32, %arg2: i32, %arg3: memref<1x2048xf32, #tpu.memory_space<vmem>>, %arg4: memref<1x2048xf32, #tpu.memory_space<vmem>>, %arg5: memref<1x1xf32, #tpu.memory_space<smem>>, %arg6: memref<1x2048xf32, #tpu.memory_space<vmem>>) attributes {dimension_semantics = [#tpu.dimension_semantics<parallel>, #tpu.dimension_semantics<arbitrary>, #tpu.dimension_semantics<arbitrary>], iteration_bounds = array<i64: 1, 1, 1>, scalar_prefetch = 0 : i64, scratch_operands = 1 : i64, tpu.core_type = #tpu.core_type<tc>, window_params = [{transform_indices = @transform_0, window_bounds = array<i64: 1, 2048>}, {transform_indices = @transform_1, window_bounds = array<i64: 1, 2048>}, {transform_indices = @transform_2, window_bounds = array<i64: 1, 1>}]} {
    %c0_i32 = arith.constant 0 : i32
    %0 = arith.cmpi eq, %arg1, %c0_i32 : i32
    %c0_i32_0 = arith.constant 0 : i32
    %1 = arith.cmpi eq, %arg2, %c0_i32_0 : i32
    %2 = arith.andi %0, %1 : i1
    %3 = arith.extui %2 : i1 to i32
    %c0_i32_1 = arith.constant 0 : i32
    %4 = arith.cmpi ne, %3, %c0_i32_1 : i32
    scf.if %4 {
      %cst_14 = arith.constant 0.000000e+00 : f32
      %31 = vector.broadcast %cst_14 : f32 to vector<1x2048xf32>
      %c0_15 = arith.constant 0 : index
      %c0_16 = arith.constant 0 : index
      %32 = vector.load %arg6[%c0_15, %c0_16] : memref<1x2048xf32, #tpu.memory_space<vmem>>, vector<1x2048xf32>
      tpu.vector_store %arg6[%c0_15, %c0_16], %31 {strides = array<i32>} : memref<1x2048xf32, #tpu.memory_space<vmem>>, vector<1x2048xf32>,
    } else {
    }
    %c0 = arith.constant 0 : index
    %c0_2 = arith.constant 0 : index
    %5 = vector.load %arg3[%c0, %c0_2] : memref<1x2048xf32, #tpu.memory_space<vmem>>, vector<1x2048xf32>
    %c0_3 = arith.constant 0 : index
    %c0_4 = arith.constant 0 : index
    %6 = vector.load %arg4[%c0_3, %c0_4] : memref<1x2048xf32, #tpu.memory_space<vmem>>, vector<1x2048xf32>
    %7 = arith.subf %5, %6 : vector<1x2048xf32>
    %8 = math.absf %7 : vector<1x2048xf32>
    %cst = arith.constant -2.000000e+00 : f32
    %9 = vector.broadcast %cst : f32 to vector<1x2048xf32>
    %10 = arith.mulf %9, %8 : vector<1x2048xf32>
    %11 = math.exp %10 : vector<1x2048xf32>
    %12 = math.log1p %11 : vector<1x2048xf32>
    %13 = arith.addf %8, %12 : vector<1x2048xf32>
    %cst_5 = arith.constant 0.693147182 : f32
    %14 = vector.broadcast %cst_5 : f32 to vector<1x2048xf32>
    %15 = arith.subf %13, %14 : vector<1x2048xf32>
    %c1_i32 = arith.constant 1 : i32
    %16 = arith.muli %arg0, %c1_i32 : i32
    %17 = arith.addi %16, %arg1 : i32
    %c1_i32_6 = arith.constant 1 : i32
    %18 = arith.addi %17, %c1_i32_6 : i32
    %c1_i32_7 = arith.constant 1 : i32
    %19 = arith.muli %18, %c1_i32_7 : i32
    %c1_i32_8 = arith.constant 1 : i32
    %20 = arith.cmpi sle, %19, %c1_i32_8 : i32
    %21 = arith.extui %20 : i1 to i32
    %c0_i32_9 = arith.constant 0 : i32
    %22 = arith.cmpi ne, %21, %c0_i32_9 : i32
    scf.if %22 {
      %c0_14 = arith.constant 0 : index
      %c0_15 = arith.constant 0 : index
      %31 = vector.load %arg6[%c0_14, %c0_15] : memref<1x2048xf32, #tpu.memory_space<vmem>>, vector<1x2048xf32>
      %cst_16 = arith.constant dense<0.000000e+00> : vector<2048xf32>
      %32 = vector.multi_reduction <add>, %15, %cst_16 [0] : vector<1x2048xf32> to vector<2048xf32>
      %33 = vector.shape_cast %32 : vector<2048xf32> to vector<1x2048xf32>
      %34 = arith.addf %31, %33 : vector<1x2048xf32>
      %c0_17 = arith.constant 0 : index
      %c0_18 = arith.constant 0 : index
      %35 = vector.load %arg6[%c0_17, %c0_18] : memref<1x2048xf32, #tpu.memory_space<vmem>>, vector<1x2048xf32>
      tpu.vector_store %arg6[%c0_17, %c0_18], %34 {strides = array<i32>} : memref<1x2048xf32, #tpu.memory_space<vmem>>, vector<1x2048xf32>,
    } else {
    }
    %true = arith.constant true
    %23 = arith.xori %20, %true : i1
    %24 = arith.extui %23 : i1 to i32
    %c0_i32_10 = arith.constant 0 : i32
    %25 = arith.cmpi ne, %24, %c0_i32_10 : i32
    scf.if %25 {
      %c1_i32_14 = arith.constant 1 : i32
      %31 = arith.muli %17, %c1_i32_14 : i32
      %32 = tpu.iota {dimensions = array<i32: 0>} : vector<1x1xi32>
      %33 = vector.broadcast %31 : i32 to vector<1x1xi32>
      %34 = arith.addi %33, %32 : vector<1x1xi32>
      %c1_i32_15 = arith.constant 1 : i32
      %35 = vector.broadcast %c1_i32_15 : i32 to vector<1x1xi32>
      %36 = arith.cmpi slt, %34, %35 : vector<1x1xi32>
      %cst_16 = arith.constant 0.000000e+00 : f32
      %37 = vector.shape_cast %36 : vector<1x1xi1> to vector<1x1xi1>
      %38 = vector.broadcast %37 : vector<1x1xi1> to vector<1x2048xi1>
      %39 = vector.broadcast %cst_16 : f32 to vector<1x2048xf32>
      %40 = arith.select %38, %15, %39 : vector<1x2048xi1>, vector<1x2048xf32>
      %c0_17 = arith.constant 0 : index
      %c0_18 = arith.constant 0 : index
      %41 = vector.load %arg6[%c0_17, %c0_18] : memref<1x2048xf32, #tpu.memory_space<vmem>>, vector<1x2048xf32>
      %cst_19 = arith.constant dense<0.000000e+00> : vector<2048xf32>
      %42 = vector.multi_reduction <add>, %40, %cst_19 [0] : vector<1x2048xf32> to vector<2048xf32>
      %43 = vector.shape_cast %42 : vector<2048xf32> to vector<1x2048xf32>
      %44 = arith.addf %41, %43 : vector<1x2048xf32>
      %c0_20 = arith.constant 0 : index
      %c0_21 = arith.constant 0 : index
      %45 = vector.load %arg6[%c0_20, %c0_21] : memref<1x2048xf32, #tpu.memory_space<vmem>>, vector<1x2048xf32>
      tpu.vector_store %arg6[%c0_20, %c0_21], %44 {strides = array<i32>} : memref<1x2048xf32, #tpu.memory_space<vmem>>, vector<1x2048xf32>,
    } else {
    }
    %c0_i32_11 = arith.constant 0 : i32
    %26 = arith.cmpi eq, %arg1, %c0_i32_11 : i32
    %c0_i32_12 = arith.constant 0 : i32
    %27 = arith.cmpi eq, %arg2, %c0_i32_12 : i32
    %28 = arith.andi %26, %27 : i1
    %29 = arith.extui %28 : i1 to i32
    %c0_i32_13 = arith.constant 0 : i32
    %30 = arith.cmpi ne, %29, %c0_i32_13 : i32
    scf.if %30 {
      %c0_14 = arith.constant 0 : index
      %c0_15 = arith.constant 0 : index
      %31 = vector.load %arg6[%c0_14, %c0_15] : memref<1x2048xf32, #tpu.memory_space<vmem>>, vector<1x2048xf32>
      %32 = vector.shape_cast %31 : vector<1x2048xf32> to vector<1x1x2048xf32>
      %cst_16 = arith.constant dense<0.000000e+00> : vector<1xf32>
      %33 = vector.multi_reduction <add>, %32, %cst_16 [1, 2] : vector<1x1x2048xf32> to vector<1xf32>
      %34 = vector.shape_cast %33 : vector<1xf32> to vector<1x1x1xf32>
      %35 = vector.extract %34[0, 0, 0] : f32 from vector<1x1x1xf32>
      %c0_17 = arith.constant 0 : index
      %c0_18 = arith.constant 0 : index
      %36 = memref.load %arg5[%c0_17, %c0_18] : memref<1x1xf32, #tpu.memory_space<smem>>
      memref.store %35, %arg5[%c0_17, %c0_18] : memref<1x1xf32, #tpu.memory_space<smem>>
    } else {
    }
    return
  }
  func.func @transform_0(%arg0: i32, %arg1: i32, %arg2: i32) -> (i32, i32) {
    %c1_i32 = arith.constant 1 : i32
    %0 = arith.muli %arg0, %c1_i32 : i32
    %1 = arith.addi %0, %arg1 : i32
    %c0_i32 = arith.constant 0 : i32
    %2 = arith.minsi %1, %c0_i32 : i32
    %c0_i32_0 = arith.constant 0 : i32
    return %2, %arg2 : i32, i32
  }
  func.func @transform_1(%arg0: i32, %arg1: i32, %arg2: i32) -> (i32, i32) {
    %c1_i32 = arith.constant 1 : i32
    %0 = arith.muli %arg0, %c1_i32 : i32
    %1 = arith.addi %0, %arg1 : i32
    %c0_i32 = arith.constant 0 : i32
    %2 = arith.minsi %1, %c0_i32 : i32
    %c0_i32_0 = arith.constant 0 : i32
    return %2, %arg2 : i32, i32
  }
  func.func @transform_2(%arg0: i32, %arg1: i32, %arg2: i32) -> (i32, i32) {
    %c0_i32 = arith.constant 0 : i32
    %c0_i32_0 = arith.constant 0 : i32
    return %arg0, %c0_i32 : i32, i32
  }
}

</mosaic_0001>

<bundles_post_ra>
// kernel: tpu_custom_call.1
= control target key start
LH: loop header
LB: loop body
LE: loop exit
PB: predicated region body
PF: predicated region fallthrough
CT: control target
= control target key end

     0   :  { %7 = vsyncpa [#allocation4], 0  ;;  %s662_s0 = inlined_call_operand.hbm [shape: f32[1,2048], index: 0, kind: input, shape index: {}]   ;;  %s663_s1 = inlined_call_operand.hbm [shape: f32[1,2048], index: 1, kind: input, shape index: {}]   ;;  %s664_s2 = inlined_call_operand.hbm [shape: f32[1,1], index: 2, kind: output, shape index: {}]  }
   0x1   :  { %8 = vsyncpa [#allocation7], 0 }
   0x2   :  { %9 = vsyncpa [#allocation5], 0  ;;  %s582_s9 = smov [#allocation3]   ;;  %s583_s11 = smov [#allocation6]  }
   0x3   :  { %s22_s10 = sshll.u32 %s582_s9, 4  ;;  %s38_s12 = sshll.u32 %s583_s11, 4  ;;  %s23_s10 = int_to_ptr.vmem [resolvable:$true] %s22_s10  ;;  %s39_s12 = int_to_ptr.vmem [resolvable:$true] %s38_s12 }
   0x4   :  { %s522_s15 = scalar_lea.hbm %s662_s0, 256 }
   0x5   :  { %p523_p0 = scmp.ne.s32.totalorder %s662_s0, %s522_s15  ;;  %p526_p1 = scmp.lt.u32.totalorder %s522_s15, %s662_s0 }
   0x7   :  { %p528_p2 = pnand %p526_p1, %p523_p0 }
   0x9   :  { %531 = shalt.err (!%p528_p2)
}
   0xa   :  { %s532_s20 = scalar_lea.vmem %s23_s10, 256  ;;  %p537_p4 = scmp.lt.s32.totalorder %s23_s10, %s23_s10 }
   0xb   :  { %p533_p3 = scmp.ne.s32.totalorder %s23_s10, %s532_s20  ;;  %p538_p5 = scmp.lt.s32.totalorder %s532_s20, %s532_s20 }
   0xd   :  { %p539_p6 = por %p538_p5, %p537_p4 }
   0xf   :  { %p540_p7 = pnand %p539_p6, %p533_p3 }
  0x11   :  { %543 = shalt.err (!%p540_p7)
}
  0x12   :  { %25 = dma.hbm_to_vmem [thread:$0]  %s662_s0, 256, %s23_s10, [#allocation4]  }
  0x13   :  { %s544_s25 = scalar_lea.hbm %s663_s1, 256 }
  0x14   :  { %p545_p8 = scmp.ne.s32.totalorder %s663_s1, %s544_s25  ;;  %p548_p9 = scmp.lt.u32.totalorder %s544_s25, %s663_s1 }
  0x16   :  { %p550_p10 = pnand %p548_p9, %p545_p8 }
  0x18   :  { %553 = shalt.err (!%p550_p10)
}
  0x19   :  { %s554_s30 = scalar_lea.vmem %s39_s12, 256  ;;  %p559_p12 = scmp.lt.s32.totalorder %s39_s12, %s39_s12 }
  0x1a   :  { %p555_p11 = scmp.ne.s32.totalorder %s39_s12, %s554_s30  ;;  %p560_p13 = scmp.lt.s32.totalorder %s554_s30, %s554_s30 }
  0x1c   :  { %p561_p0 = por %p560_p13, %p559_p12 }
  0x1e   :  { %p562_p1 = pnand %p561_p0, %p555_p11 }
  0x20   :  { %565 = shalt.err (!%p562_p1)
}
  0x21   :  { %41 = dma.hbm_to_vmem [thread:$0]  %s663_s1, 256, %s39_s12, [#allocation7]  }
  0x22   :  { %576 = dma.done.wait [#allocation4], 256  }
  0x23   :  { %577 = vsyncadd [#allocation4], 4294967040 }
  0x24   :  { %578 = dma.done.wait [#allocation7], 256  }
  0x25   :  { %579 = vsyncadd [#allocation7], 4294967040  ;;  %v62_v0 = vld [vmem:[#allocation3] sm:$0xff]  ;;  %v63_v1 = vld [vmem:[#allocation3 + $0x8] sm:$0xff]  ;;  %v365_v18 = vlaneseq  ;;  %vm445_vm2 = vcmask 1040384   ;;  %s566_s6 = scalar_lea.hbm %s664_s2, 16 }
  0x26   :  { %v64_v2 = vld [vmem:[#allocation6] sm:$0xff]  ;;  %v65_v3 = vld [vmem:[#allocation6 + $0x8] sm:$0xff]  ;;  %p567_p2 = scmp.ne.s32.totalorder %s664_s2, %s566_s6  ;;  %p570_p3 = scmp.lt.u32.totalorder %s566_s6, %s664_s2 }
  0x27   :  { %v66_v4 = vsub.f32 %v62_v0, %v64_v2  ;;  %v67_v5 = vsub.f32 %v63_v1, %v65_v3  ;;  %v624_v22 = vshrl.u32 %v365_v18, 7 }
  0x28   :  { %p572_p4 = pnand %p570_p3, %p567_p2 }
  0x29   :  { %v68_v6 = vand.u32 2147483647, %v66_v4  ;;  %v69_v7 = vand.u32 2147483647, %v67_v5  ;;  %v367_v29 = vsub.s32 0, %v624_v22  ;;  %v371_v30 = vsub.s32 1, %v624_v22 }
  0x2a   :  { %v375_v34 = vsub.s32 2, %v624_v22  ;;  %v379_v36 = vsub.s32 3, %v624_v22  ;;  %v383_v37 = vsub.s32 4, %v624_v22  ;;  %v387_v43 = vsub.s32 5, %v624_v22 }
  0x2b   :  { %v70_v8 = vmul.f32 -2.0, %v68_v6  ;;  %v71_v9 = vmul.f32 -2.0, %v69_v7  ;;  %v391_v45 = vsub.s32 6, %v624_v22  ;;  %v395_v52 = vsub.s32 7, %v624_v22 }
  0x2d   :  { %v72_v10 = vmul.f32 1.442695, %v70_v8  ;;  %v74_v11 = vmul.f32 1.442695, %v71_v9 }
  0x2f   :  { %514 = vpow2.f32 %v72_v10 }
  0x30   :  { %516 = vpow2.f32 %v74_v11 }
  0x39   :  { %v515_v12 = vpop.eup %514 }
  0x3a   :  { %v517_v13 = vpop.eup %516  ;;  %v76_v14 = vadd.f32 1.0, %v515_v12  ;;  %v79_v16 = vmul.f32 -0.5, %v515_v12  ;;  %v82_v19 = vand.u32 2147483647, %v515_v12 }
  0x3b   :  { %v85_v15 = vadd.f32 1.0, %v517_v13  ;;  %v88_v20 = vmul.f32 -0.5, %v517_v13  ;;  %v91_v27 = vand.u32 2147483647, %v517_v13 }
  0x3c   :  { %518 = vlog2.f32 %v76_v14  ;;  %v80_v17 = vadd.f32 1.0, %v79_v16  ;;  %vm83_vm0 = vcmp.lt.f32.partialorder %v82_v19, 0.0004427343 }
  0x3d   :  { %520 = vlog2.f32 %v85_v15  ;;  %v89_v24 = vadd.f32 1.0, %v88_v20  ;;  %vm92_vm1 = vcmp.lt.f32.partialorder %v91_v27, 0.0004427343 }
  0x3e   :  { %v81_v21 = vmul.f32 %v515_v12, %v80_v17 }
  0x3f   :  { %v90_v32 = vmul.f32 %v517_v13, %v89_v24 }
  0x46   :  { %v519_v23 = vpop.eup %518 }
  0x47   :  { %v521_v25 = vpop.eup %520  ;;  %v78_v26 = vmul.f32 0.6931472, %v519_v23 }
  0x48   :  { %v87_v31 = vmul.f32 0.6931472, %v521_v25 }
  0x49   :  { %v84_v28 = vsel %vm83_vm0, %v81_v21, %v78_v26 }
  0x4a   :  { %v94_v33 = vadd.f32 %v84_v28, %v68_v6  ;;  %v93_v38 = vsel %vm92_vm1, %v90_v32, %v87_v31 }
  0x4b   :  { %v95_v44 = vadd.f32 %v93_v38, %v69_v7 }
  0x4c   :  { %v507_v35 = vadd.f32 -0.6931472, %v94_v33 }
  0x4d   :  { %v508_v55 = vadd.f32 -0.6931472, %v95_v44 }
  0x4e   :  { %v368_v39 = vrot.slane %v507_v35, %v367_v29  ;;  %v372_v40 = vrot.slane %v507_v35, %v371_v30  ;;  %v376_v41 = vrot.slane %v507_v35, %v375_v34  ;;  %v380_v42 = vrot.slane %v507_v35, %v379_v36 }
  0x4f   :  { %v384_v46 = vrot.slane %v507_v35, %v383_v37  ;;  %v388_v51 = vrot.slane %v507_v35, %v387_v43  ;;  %v392_v56 = vrot.slane %v507_v35, %v391_v45  ;;  %v396_v59 = vrot.slane %v507_v35, %v395_v52 }
  0x50   :  { %v446_v47 = vsel %vm445_vm2, %v368_v39, 0.0  ;;  %v447_v48 = vsel %vm445_vm2, %v372_v40, 0.0  ;;  %v449_v49 = vsel %vm445_vm2, %v376_v41, 0.0  ;;  %v451_v53 = vsel %vm445_vm2, %v380_v42, 0.0 }
  0x51   :  { %v448_v50 = vadd.f32 %v447_v48, %v446_v47  ;;  %v453_v57 = vsel %vm445_vm2, %v384_v46, 0.0  ;;  %v455_v60 = vsel %vm445_vm2, %v388_v51, 0.0  ;;  %v400_v62 = vrot.slane %v508_v55, %v367_v29 }
  0x52   :  { %v457_v63 = vsel %vm445_vm2, %v392_v56, 0.0  ;;  %v404_v1 = vrot.slane %v508_v55, %v371_v30  ;;  %v459_v2 = vsel %vm445_vm2, %v396_v59, 0.0  ;;  %v408_v4 = vrot.slane %v508_v55, %v375_v34 }
  0x53   :  { %v450_v54 = vadd.f32 %v449_v49, %v448_v50  ;;  %v461_v5 = vsel %vm445_vm2, %v400_v62, 0.0  ;;  %v412_v7 = vrot.slane %v508_v55, %v379_v36  ;;  %v416_v10 = vrot.slane %v508_v55, %v383_v37 }
  0x54   :  { %v463_v8 = vsel %vm445_vm2, %v404_v1, 0.0  ;;  %v465_v11 = vsel %vm445_vm2, %v408_v4, 0.0  ;;  %v420_v13 = vrot.slane %v508_v55, %v387_v43  ;;  %v424_v16 = vrot.slane %v508_v55, %v391_v45 }
  0x55   :  { %v452_v58 = vadd.f32 %v451_v53, %v450_v54  ;;  %v467_v14 = vsel %vm445_vm2, %v412_v7, 0.0  ;;  %v469_v17 = vsel %vm445_vm2, %v416_v10, 0.0  ;;  %v428_v19 = vrot.slane %v508_v55, %v395_v52 }
  0x56   :  { %v471_v20 = vsel %vm445_vm2, %v420_v13, 0.0  ;;  %v473_v22 = vsel %vm445_vm2, %v424_v16, 0.0 }
  0x57   :  { %v454_v61 = vadd.f32 %v453_v57, %v452_v58  ;;  %v475_v24 = vsel %vm445_vm2, %v428_v19, 0.0 }
  0x59   :  { %v456_v0 = vadd.f32 %v455_v60, %v454_v61 }
  0x5b   :  { %v458_v3 = vadd.f32 %v457_v63, %v456_v0 }
  0x5d   :  { %v460_v6 = vadd.f32 %v459_v2, %v458_v3 }
  0x5f   :  { %v462_v9 = vadd.f32 %v461_v5, %v460_v6 }
  0x61   :  { %v464_v12 = vadd.f32 %v463_v8, %v462_v9 }
  0x63   :  { %v466_v15 = vadd.f32 %v465_v11, %v464_v12 }
  0x65   :  { %v468_v18 = vadd.f32 %v467_v14, %v466_v15 }
  0x67   :  { %v470_v21 = vadd.f32 %v469_v17, %v468_v18 }
  0x69   :  { %v472_v23 = vadd.f32 %v471_v20, %v470_v21 }
  0x6b   :  { %v474_v25 = vadd.f32 %v473_v22, %v472_v23 }
  0x6d   :  { %v476_v26 = vadd.f32 %v475_v24, %v474_v25 }
  0x6f   :  { %477 = vadd.xlane.f32.xlu0 %v476_v26 }
  0xfc   :  { %v478_v27 = vpop.xlane.xlu0 %477 }
  0xfd   :  { %v479_v28 = vrot.slane %v478_v27, 4 }
  0xff   :  { %v480_v29 = vadd.f32 %v479_v28, %v478_v27 }
 0x101   :  { %v481_v30 = vrot.slane %v480_v29, 2 }
 0x103   :  { %v482_v31 = vadd.f32 %v481_v30, %v480_v29 }
 0x105   :  { %v483_v32 = vrot.slane %v482_v31, 1 }
 0x107   :  { %v484_v33 = vadd.f32 %v483_v32, %v482_v31 }
 0x109   :  { %509 = vpush %v484_v33 }
 0x13a   :  { %s510_s1 = spop %509 }
 0x13b   :  { %487 = sst [smem:[#allocation8]] %s510_s1 }
 0x13c   :  { %575 = shalt.err (!%p572_p4)
}
 0x13d   :  { %s584_s11 = smov [#allocation8]  }
 0x13e   :  { %495 = dma.smem_to_hbm %s584_s11, 16, %s664_s2, [#allocation5]  }
 0x13f   :  { %580 = dma.done.wait [#allocation5], 16  }
 0x140   :  { %581 = vsyncadd [#allocation5], 4294967280 }
 0x141   :  { %499 = sfence }
 0x142   :  { %500 = vsyncpa [#allocation4], 1 }
 0x143   :  { %501 = vsyncpa [#allocation7], 1 }
 0x144   :  { %502 = vsyncpa [#allocation5], 1 }

</bundles_post_ra>
